<compile_context>
chip_gen: v7x
topology: tpu7x:2x2x1
jax: 0.10.0
libtpu: 0.0.40
codegen_flags: <defaults>
</compile_context>

<pallas_src>
import jax
import jax.numpy as jnp
from jax.experimental import pallas as pl
from jax.experimental.pallas import tpu as pltpu


def _round_up(x, m):
    return (x + m - 1) // m * m


def linear_kernel(w_ref, b_ref, xt_ref, ot_ref):
    # w_ref:  (OUT, IN)  VMEM, resident across all grid steps
    # b_ref:  (OUT, 1)   VMEM, resident across all grid steps
    # xt_ref: (IN, TB)   VMEM, one batch tile (batch on the lane axis)
    # ot_ref: (OUT, TB)  VMEM, lane-dense output tile
    acc = jnp.dot(w_ref[...], xt_ref[...], preferred_element_type=jnp.float32)
    ot_ref[...] = (acc + b_ref[...]).astype(ot_ref.dtype)


def toy_model_forward(x, weight, bias):
    """Equivalent to nn.Linear(10, 5): y = x @ weight.T + bias.

    x:      (B, 10) float32
    weight: (5, 10) float32   (PyTorch layout: (out_features, in_features))
    bias:   (5,)    float32
    returns (B, 5)  float32
    """
    B, in_f = x.shape
    out_f, in_f_w = weight.shape
    assert in_f == in_f_w

    # Pad the batch to a lane multiple; pick the largest tile (<=1024) that
    # divides it so the grid covers it exactly.  Per-tile VMEM in this layout
    # is only ~(16+8)*TB*4 bytes, well under the default scoped limit on
    # v5e (16 MiB) / v6e (32 MiB) / v7x (32 MiB of 64 MiB physical).
    b_pad = _round_up(B, 128)
    tb = 128
    for cand in (1024, 512, 256, 128):
        if b_pad % cand == 0:
            tb = cand
            break
    grid = (b_pad // tb,)

    # Transposed, lane-dense activations: (IN, B_pad) with batch on lanes.
    x_pad = jnp.pad(x, ((0, b_pad - B), (0, 0)))
    xt = x_pad.T                               # (in_f, b_pad)
    b2 = bias.reshape(out_f, 1)                # broadcasts over the lane axis

    cost = pl.CostEstimate(
        flops=2 * out_f * in_f * b_pad,
        transcendentals=0,
        bytes_accessed=4 * (in_f * b_pad + out_f * b_pad + out_f * in_f + out_f),
    )

    yt = pl.pallas_call(
        linear_kernel,
        out_shape=jax.ShapeDtypeStruct((out_f, b_pad), x.dtype),
        grid=grid,
        in_specs=[
            pl.BlockSpec((out_f, in_f), lambda i: (0, 0)),   # weight (resident)
            pl.BlockSpec((out_f, 1), lambda i: (0, 0)),      # bias   (resident)
            pl.BlockSpec((in_f, tb), lambda i: (0, i)),      # x tile (pipelined)
        ],
        out_specs=pl.BlockSpec((out_f, tb), lambda i: (0, i)),
        compiler_params=pltpu.CompilerParams(
            dimension_semantics=("parallel",)),
        cost_estimate=cost,
    )(weight, b2, xt)

    return yt[:, :B].T                         # back to (B, 5)


if __name__ == "__main__":
    key = jax.random.PRNGKey(0)
    kx, kw, kb = jax.random.split(key, 3)

    B, IN, OUT = 8, 10, 5   # shapes fixed by nn.Linear(10, 5); small demo batch

    x = jax.random.normal(kx, (B, IN), dtype=jnp.float32)
    weight = jax.random.normal(kw, (OUT, IN), dtype=jnp.float32) * 0.1
    bias = jax.random.normal(kb, (OUT,), dtype=jnp.float32) * 0.1

    y = toy_model_forward(x, weight, bias)
    jax.block_until_ready(y)

    # Verify against plain-JAX reference.
    y_ref = x @ weight.T + bias
    assert y.shape == (B, OUT)
    assert jnp.allclose(y, y_ref, atol=1e-5, rtol=1e-5)

    print("KERNEL_OK")
</pallas_src>

<mosaic_0001>
module attributes {stable_mosaic.version = 11 : i64} {
  func.func @linear_kernel(%arg0: i32, %arg1: memref<5x10xf32, #tpu.memory_space<vmem>>, %arg2: memref<5x1xf32, #tpu.memory_space<vmem>>, %arg3: memref<10x128xf32, #tpu.memory_space<vmem>>, %arg4: memref<5x128xf32, #tpu.memory_space<vmem>>) attributes {dimension_semantics = [#tpu.dimension_semantics<parallel>], iteration_bounds = array<i64: 1>, scalar_prefetch = 0 : i64, scratch_operands = 0 : i64, tpu.core_type = #tpu.core_type<tc>, window_params = [{pipeline_mode = #tpu.pipeline_mode<synchronous>, transform_indices = @transform_0, window_bounds = array<i64: 5, 10>}, {pipeline_mode = #tpu.pipeline_mode<synchronous>, transform_indices = @transform_1, window_bounds = array<i64: 5, 1>}, {transform_indices = @transform_2, window_bounds = array<i64: 10, 128>}, {transform_indices = @transform_3, window_bounds = array<i64: 5, 128>}]} {
    %c0 = arith.constant 0 : index
    %c0_0 = arith.constant 0 : index
    %0 = vector.load %arg1[%c0, %c0_0] : memref<5x10xf32, #tpu.memory_space<vmem>>, vector<5x10xf32>
    %c0_1 = arith.constant 0 : index
    %c0_2 = arith.constant 0 : index
    %1 = vector.load %arg3[%c0_1, %c0_2] : memref<10x128xf32, #tpu.memory_space<vmem>>, vector<10x128xf32>
    %cst = arith.constant dense<0.000000e+00> : vector<5x128xf32>
    %2 = tpu.matmul %0, %1, %cst {dimension_numbers = #tpu.dot_dimension_numbers<[1], [0], [0], [1], [0, 0, 1, 1], [], []>} : vector<5x10xf32>, vector<10x128xf32>, vector<5x128xf32> -> vector<5x128xf32>
    %c0_3 = arith.constant 0 : index
    %c0_4 = arith.constant 0 : index
    %3 = vector.load %arg2[%c0_3, %c0_4] : memref<5x1xf32, #tpu.memory_space<vmem>>, vector<5x1xf32>
    %4 = vector.broadcast %3 : vector<5x1xf32> to vector<5x128xf32>
    %5 = arith.addf %2, %4 : vector<5x128xf32>
    %c0_5 = arith.constant 0 : index
    %c0_6 = arith.constant 0 : index
    %6 = vector.load %arg4[%c0_5, %c0_6] : memref<5x128xf32, #tpu.memory_space<vmem>>, vector<5x128xf32>
    tpu.vector_store %arg4[%c0_5, %c0_6], %5 {strides = array<i32>} : memref<5x128xf32, #tpu.memory_space<vmem>>, vector<5x128xf32>,
    return
  }
  func.func @transform_0(%arg0: i32) -> (i32, i32) {
    %c0_i32 = arith.constant 0 : i32
    %c0_i32_0 = arith.constant 0 : i32
    %c0_i32_1 = arith.constant 0 : i32
    return %c0_i32, %c0_i32_0 : i32, i32
  }
  func.func @transform_1(%arg0: i32) -> (i32, i32) {
    %c0_i32 = arith.constant 0 : i32
    %c0_i32_0 = arith.constant 0 : i32
    %c0_i32_1 = arith.constant 0 : i32
    return %c0_i32, %c0_i32_0 : i32, i32
  }
  func.func @transform_2(%arg0: i32) -> (i32, i32) {
    %c0_i32 = arith.constant 0 : i32
    %c0_i32_0 = arith.constant 0 : i32
    return %c0_i32, %arg0 : i32, i32
  }
  func.func @transform_3(%arg0: i32) -> (i32, i32) {
    %c0_i32 = arith.constant 0 : i32
    %c0_i32_0 = arith.constant 0 : i32
    return %c0_i32, %arg0 : i32, i32
  }
}

</mosaic_0001>

<bundles_post_ra>
// kernel: tpu_custom_call.1
= control target key start
LH: loop header
LB: loop body
LE: loop exit
PB: predicated region body
PF: predicated region fallthrough
CT: control target
= control target key end

     0   :  { %8 = vsyncpa [#allocation3], 0  ;;  %s262_s0 = inlined_call_operand.hbm [shape: f32[5,10], index: 0, kind: input, shape index: {}]   ;;  %s263_s1 = inlined_call_operand.vmem [shape: f32[5,1], index: 1, kind: input, shape index: {}]   ;;  %s264_s2 = inlined_call_operand.vmem [shape: f32[10,128], index: 2, kind: input, shape index: {}]   ;;  %s265_s3 = inlined_call_operand.hbm [shape: f32[5,128], index: 3, kind: output, shape index: {}]  }
   0x1   :  { %9 = vsyncpa [#allocation4], 0  ;;  %s202_s12 = smov [#allocation2]   ;;  %s154_s16 = scalar_lea.hbm %s262_s0, 128 }
   0x2   :  { %s16_s13 = sshll.u32 %s202_s12, 4  ;;  %p155_p0 = scmp.ne.s32.totalorder %s262_s0, %s154_s16  ;;  %s17_s13 = int_to_ptr.vmem [resolvable:$true] %s16_s13 }
   0x3   :  { %p158_p1 = scmp.lt.u32.totalorder %s154_s16, %s262_s0 }
   0x5   :  { %p160_p2 = pnand %p158_p1, %p155_p0 }
   0x7   :  { %163 = shalt.err (!%p160_p2)
}
   0x8   :  { %s164_s21 = scalar_lea.vmem %s17_s13, 128  ;;  %p169_p4 = scmp.lt.s32.totalorder %s17_s13, %s17_s13 }
   0x9   :  { %p165_p3 = scmp.ne.s32.totalorder %s17_s13, %s164_s21  ;;  %p170_p5 = scmp.lt.s32.totalorder %s164_s21, %s164_s21 }
   0xb   :  { %p171_p6 = por %p170_p5, %p169_p4 }
   0xd   :  { %p172_p7 = pnand %p171_p6, %p165_p3 }
   0xf   :  { %175 = shalt.err (!%p172_p7)
}
  0x10   :  { %19 = dma.hbm_to_vmem [thread:$0]  %s262_s0, 128, %s17_s13, [#allocation3]  }
  0x11   :  { %198 = dma.done.wait [#allocation3], 128  }
  0x12   :  { %199 = vsyncadd [#allocation3], 4294967168  ;;  %v203_v0 = vmov 0.0|0.0   ;;  %vm204_vm0 = vmmov 0   ;;  %v205_v1 = vmov 0.0   ;;  %v206_v2 = vmov 0  }
  0x13   :  { %142 = vmatprep.subr.bf16.mxu0 %v203_v0  ;;  %139 = vmatprep.mubr.msk.f32.mxu0 %vm204_vm0, %v205_v1  ;;  %vm40_vm1 = vcmask 1041408   ;;  %v28_v3 = vld [vmem:[%s264_s2] sm:$0xff]  ;;  %v29_v4 = vld [vmem:[%s264_s2 + $0x8] sm:$0x3]  ;;  %vm207_vm2 = vmmov 1   ;;  %vm36_vm4 = vcmask 80896  }
  0x14   :  { %153 = vset.pattern.permute.xlu0 %v206_v2  ;;  %vm144_vm3 = vmpackc.low %vm40_vm1, %vm207_vm2  ;;  %v143_v5 = vpack.c.bf16 %v29_v4, %v28_v3  ;;  %v30_v6 = vld [vmem:[%s263_s1] sm:$0x1f]  ;;  %s208_s29 = smov [#allocation5]  }
  0x15   :  { %33 = vperm.xlu0 %153, %v30_v6   ;;  %v27_v7 = vld [vmem:[#allocation2] sm:$0x1f]  ;;  %s121_s30 = sshll.u32 %s208_s29, 4  ;;  %s122_s30 = int_to_ptr.vmem [resolvable:$true] %s121_s30 }
  0x16   :  { %145 = vmatpush3.bf16.msk.msra.mxu0 %vm144_vm3, %v143_v5  ;;  %s176_s2 = scalar_lea.vmem %s122_s30, 128  ;;  %p181_p9 = scmp.lt.s32.totalorder %s122_s30, %s122_s30 }
  0x17   :  { %p177_p8 = scmp.ne.s32.totalorder %s122_s30, %s176_s2  ;;  %p182_p10 = scmp.lt.s32.totalorder %s176_s2, %s176_s2 }
  0x19   :  { %140 = vmatmul.mubr.msk.f32.vlgmr.msra.gmra.mrb[0].mxu0 %vm36_vm4, %v27_v7  ;;  %p183_p11 = por %p182_p10, %p181_p9 }
  0x1b   :  { %p184_p12 = pnand %p183_p11, %p177_p8 }
  0x94   :  { %v34_v8 = vpop.permute.xlu0 %33 }
  0xec   :  { %v110_v9 = vpop.f32.mrb[0].mxu0 }
  0xed   :  { %v111_v10 = vadd.f32 %v110_v9, %v34_v8  ;;  %v141_v11 = vpop.f32.mrb[1].mxu0 }
  0xef   :  { %114 = vst [vmem:[#allocation5] sm:$0x1f] %v111_v10 }
  0xf0   :  { %187 = shalt.err (!%p184_p12)
}
  0xf1   :  { %s188_s5 = scalar_lea.hbm %s265_s3, 128 }
  0xf2   :  { %p189_p13 = scmp.ne.s32.totalorder %s265_s3, %s188_s5  ;;  %p192_p0 = scmp.lt.u32.totalorder %s188_s5, %s265_s3 }
  0xf4   :  { %p194_p1 = pnand %p192_p0, %p189_p13 }
  0xf6   :  { %197 = shalt.err (!%p194_p1)
}
  0xf7   :  { %124 = dma.vmem_to_hbm [thread:$0]  %s122_s30, 128, %s265_s3, [#allocation4]  }
  0xf8   :  { %200 = dma.done.wait [#allocation4], 128  }
  0xf9   :  { %201 = vsyncadd [#allocation4], 4294967168 }
  0xfa   :  { %128 = vsyncpa [#allocation3], 1 }
  0xfb   :  { %129 = vsyncpa [#allocation4], 1 }

</bundles_post_ra>
